<compile_context>
chip_gen: v7x
topology: tpu7x:2x2x1
jax: 0.10.0
libtpu: 0.0.40
codegen_flags: <defaults>
</compile_context>

<pallas_src>
import numpy as np
import jax
import jax.numpy as jnp
from jax.experimental import pallas as pl
from jax.experimental.pallas import tpu as pltpu


# --------------------------------------------------------------------------------------
# Parameter init (identical to LossWithBeliveMaps.get_gaussian_kernel)
# --------------------------------------------------------------------------------------
def get_gaussian_kernel(gauss_sigma: float) -> jnp.ndarray:
    kernel_size = int(gauss_sigma * 4)
    if kernel_size % 2 == 0:
        kernel_size += 1
    rr = kernel_size // 2
    x = jnp.linspace(-rr, rr, kernel_size, dtype=jnp.float32)
    y = jnp.linspace(-rr, rr, kernel_size, dtype=jnp.float32)
    xv, yv = jnp.meshgrid(x, y, indexing="ij")   # torch.meshgrid default is 'ij'
    return jnp.exp(-(xv ** 2 + yv ** 2) / (2.0 * gauss_sigma ** 2))


# --------------------------------------------------------------------------------------
# targets -> point masks  (replicates _targets2inds + masks[b, ch, y, x] = 1.0)
# Data-dependent ragged scatter: done as JAX glue, not inside the Pallas kernel.
# --------------------------------------------------------------------------------------
def targets_to_masks(targets, shape):
    B, C, H, W = shape
    masks = jnp.zeros(shape, jnp.float32)
    for ii, s in enumerate(targets):
        if s.shape[0] == 0:
            continue
        n, ssz, _ = s.shape                      # ssz == S == C
        x_ind = s[..., 0]
        y_ind = s[..., 1]
        ch_ind = jnp.broadcast_to(jnp.arange(ssz), (n, ssz))
        masks = masks.at[ii, ch_ind, y_ind, x_ind].set(1.0)
    return masks


# --------------------------------------------------------------------------------------
# Host-side helpers: separable factorization + banded Toeplitz operators
# --------------------------------------------------------------------------------------
def _band_toeplitz(n, taps, pad):
    """T[out, inn] = taps[inn - out + pad] if 0 <= inn - out + pad < K else 0."""
    taps = np.asarray(taps, dtype=np.float64)
    K = taps.shape[0]
    out_idx = np.arange(n)[:, None]
    in_idx = np.arange(n)[None, :]
    d = in_idx - out_idx + pad
    valid = (d >= 0) & (d < K)
    return np.where(valid, taps[np.clip(d, 0, K - 1)], 0.0).astype(np.float32)


def _conv_operators(gaussian_kernel, H, W, increase_factor):
    """Build (R, H, H) left and (R, W, W) right Toeplitz operators so that
    conv2d_same(M, g) * inc == sum_r Gy[r] @ M @ Gx[r]."""
    g = np.asarray(jax.device_get(gaussian_kernel), dtype=np.float32)
    K = g.shape[0]
    pad = K // 2
    u, sv, vt = np.linalg.svd(g.astype(np.float64))
    keep = [r for r in range(len(sv)) if sv[r] > sv[0] * 1e-6] or [0]   # gaussian init -> rank 1
    Gy = np.stack([_band_toeplitz(H, u[:, r] * sv[r], pad) for r in keep])
    Gx = np.stack([_band_toeplitz(W, vt[r, :], pad).T for r in keep])
    Gy = (Gy * float(increase_factor)).astype(np.float32)   # fold increase_factor into Gy
    return jnp.asarray(Gy), jnp.asarray(Gx.astype(np.float32)), pad


# --------------------------------------------------------------------------------------
# Pallas kernel: per grid step, Bt fused batch elements
#   belief_b = sum_r Gy[r] @ mask_sum_b @ Gx[r]          (MXU)
#   out     += sum_c (pred_b[c] - belief_b)^2            (VPU, accumulated per-pixel)
# --------------------------------------------------------------------------------------
def _loss_kernel(gy_ref, gx_ref, mask_ref, pred_ref, out_ref):
    Bt = pred_ref.shape[0]
    R = gy_ref.shape[0]
    H, W = mask_ref.shape[1], mask_ref.shape[2]

    s = pl.program_id(1)

    @pl.when(s == 0)
    def _():
        out_ref[...] = jnp.zeros_like(out_ref)

    gy_all = gy_ref[...]          # (R, H, H), increase_factor pre-folded
    gx_all = gx_ref[...]          # (R, W, W)

    total = jnp.zeros((H, W), jnp.float32)
    for b in range(Bt):           # static unroll, Bt small
        m = mask_ref[b]                                               # (H, W) channel-summed mask
        bel = jnp.zeros((H, W), jnp.float32)
        for r in range(R):                                            # R == 1 for gaussian init
            t = jnp.dot(gy_all[r], m, preferred_element_type=jnp.float32)     # row pass (MXU)
            bel = bel + jnp.dot(t, gx_all[r], preferred_element_type=jnp.float32)  # col pass (MXU)
        d = pred_ref[b].astype(jnp.float32) - bel[None, :, :]          # (C, H, W) broadcast diff
        total = total + jnp.sum(d * d, axis=0)                         # reduce channels

    out_ref[...] += total[None, :, :]                                  # accumulate batch blocks


# --------------------------------------------------------------------------------------
# Wrapper
# --------------------------------------------------------------------------------------
def loss_with_believe_maps(prediction, targets, gaussian_kernel, increase_factor=1.0):
    B, C, H, W = prediction.shape

    Gy, Gx, _ = _conv_operators(gaussian_kernel, H, W, increase_factor)
    R = Gy.shape[0]

    # point masks -> channel sum (sparse, trivial XLA glue)
    masks = targets_to_masks(targets, (B, C, H, W))
    mask_sum = jnp.sum(masks, axis=1)                                  # (B, H, W)

    # batch fusion: largest divisor of B whose double-buffered blocks fit a safe VMEM budget
    budget = 16 * 1024 * 1024
    per_b = C * H * W * prediction.dtype.itemsize + H * W * 4
    max_bt = max(1, budget // (2 * per_b))
    Bt = max(d for d in range(1, B + 1) if B % d == 0 and d <= max_bt)
    nblk = B // Bt
    P = 2 if nblk % 2 == 0 else 1          # parallel shards (2nd TensorCore on v7x)
    S = nblk // P                          # accumulation steps per shard

    sq_map = pl.pallas_call(
        _loss_kernel,
        grid=(P, S),
        in_specs=[
            pl.BlockSpec((R, H, H), lambda p_, s_: (0, 0, 0)),          # Gy (resident)
            pl.BlockSpec((R, W, W), lambda p_, s_: (0, 0, 0)),          # Gx (resident)
            pl.BlockSpec((Bt, H, W), lambda p_, s_: (p_ * S + s_, 0, 0)),       # mask sums
            pl.BlockSpec((Bt, C, H, W), lambda p_, s_: (p_ * S + s_, 0, 0, 0)),  # prediction
        ],
        out_specs=pl.BlockSpec((1, H, W), lambda p_, s_: (p_, 0, 0)),   # per-shard accumulator
        out_shape=jax.ShapeDtypeStruct((P, H, W), jnp.float32),
        compiler_params=pltpu.CompilerParams(
            dimension_semantics=("parallel", "arbitrary")),
    )(Gy, Gx, mask_sum, prediction)

    # final mean: sum of per-pixel partials / numel of the broadcast shape (B*C*H*W)
    return jnp.sum(sq_map) / (B * C * H * W)


# --------------------------------------------------------------------------------------
# Pure-JAX reference replicating the PyTorch forward semantics
# --------------------------------------------------------------------------------------
def reference_loss(prediction, targets, gaussian_kernel, increase_factor=1.0):
    B, C, H, W = prediction.shape
    K = gaussian_kernel.shape[0]
    p = K // 2
    masks = targets_to_masks(targets, prediction.shape)
    weight = jnp.broadcast_to(gaussian_kernel, (1, C, K, K))
    belive_map = jax.lax.conv_general_dilated(
        masks, weight, window_strides=(1, 1), padding=((p, p), (p, p)),
        dimension_numbers=("NCHW", "OIHW", "NCHW"))
    belive_map = belive_map * increase_factor               # (B, 1, H, W)
    return jnp.mean((prediction - belive_map) ** 2)


if __name__ == "__main__":
    key = jax.random.PRNGKey(0)
    B, C, H, W = 2, 4, 16, 16       # C == number of skeleton segments S
    N_PTS = 3                       # skeletons per image

    k_pred, k_tgt = jax.random.split(key)
    prediction = jax.random.normal(k_pred, (B, C, H, W), dtype=jnp.float32)

    targets = []
    for _ in range(B):
        k_tgt, kb = jax.random.split(k_tgt)
        coords = jax.random.randint(kb, (N_PTS, C, 2), 0, H, dtype=jnp.int32)  # (x, y) pairs
        targets.append(coords)

    gaussian_kernel = get_gaussian_kernel(2.0)   # (9, 9) parameter, deterministic init

    loss = jax.block_until_ready(loss_with_believe_maps(prediction, targets, gaussian_kernel))
    ref = jax.block_until_ready(reference_loss(prediction, targets, gaussian_kernel))
    np.testing.assert_allclose(np.asarray(loss), np.asarray(ref), rtol=1e-4, atol=1e-5)

    print("KERNEL_OK")
</pallas_src>

<mosaic_0001>
module attributes {stable_mosaic.version = 11 : i64} {
  func.func @_loss_kernel(%arg0: i32, %arg1: i32, %arg2: memref<1x16x16xf32, #tpu.memory_space<vmem>>, %arg3: memref<1x16x16xf32, #tpu.memory_space<vmem>>, %arg4: memref<2x16x16xf32, #tpu.memory_space<vmem>>, %arg5: memref<2x4x16x16xf32, #tpu.memory_space<vmem>>, %arg6: memref<1x16x16xf32, #tpu.memory_space<vmem>>) attributes {dimension_semantics = [#tpu.dimension_semantics<parallel>, #tpu.dimension_semantics<arbitrary>], iteration_bounds = array<i64: 1, 1>, scalar_prefetch = 0 : i64, scratch_operands = 0 : i64, tpu.core_type = #tpu.core_type<tc>, window_params = [{pipeline_mode = #tpu.pipeline_mode<synchronous>, transform_indices = @transform_0, window_bounds = array<i64: 1, 16, 16>}, {pipeline_mode = #tpu.pipeline_mode<synchronous>, transform_indices = @transform_1, window_bounds = array<i64: 1, 16, 16>}, {transform_indices = @transform_2, window_bounds = array<i64: 2, 16, 16>}, {transform_indices = @transform_3, window_bounds = array<i64: 2, 4, 16, 16>}, {transform_indices = @transform_4, window_bounds = array<i64: 1, 16, 16>}]} {
    %c0_i32 = arith.constant 0 : i32
    %0 = arith.cmpi eq, %arg1, %c0_i32 : i32
    %1 = arith.extui %0 : i1 to i32
    %c0_i32_0 = arith.constant 0 : i32
    %2 = arith.cmpi ne, %1, %c0_i32_0 : i32
    scf.if %2 {
      %cst_33 = arith.constant 0.000000e+00 : f32
      %42 = vector.broadcast %cst_33 : f32 to vector<1x16x16xf32>
      %c0_34 = arith.constant 0 : index
      %c0_35 = arith.constant 0 : index
      %c0_36 = arith.constant 0 : index
      %43 = vector.load %arg6[%c0_34, %c0_35, %c0_36] : memref<1x16x16xf32, #tpu.memory_space<vmem>>, vector<1x16x16xf32>
      tpu.vector_store %arg6[%c0_34, %c0_35, %c0_36], %42 {strides = array<i32>} : memref<1x16x16xf32, #tpu.memory_space<vmem>>, vector<1x16x16xf32>,
    } else {
    }
    %c0 = arith.constant 0 : index
    %c0_1 = arith.constant 0 : index
    %c0_2 = arith.constant 0 : index
    %3 = vector.load %arg2[%c0, %c0_1, %c0_2] : memref<1x16x16xf32, #tpu.memory_space<vmem>>, vector<1x16x16xf32>
    %c0_3 = arith.constant 0 : index
    %c0_4 = arith.constant 0 : index
    %c0_5 = arith.constant 0 : index
    %4 = vector.load %arg3[%c0_3, %c0_4, %c0_5] : memref<1x16x16xf32, #tpu.memory_space<vmem>>, vector<1x16x16xf32>
    %cst = arith.constant 0.000000e+00 : f32
    %5 = vector.broadcast %cst : f32 to vector<16x16xf32>
    %c0_6 = arith.constant 0 : index
    %c0_7 = arith.constant 0 : index
    %c0_8 = arith.constant 0 : index
    %6 = vector.load %arg4[%c0_6, %c0_7, %c0_8] : memref<2x16x16xf32, #tpu.memory_space<vmem>>, vector<1x16x16xf32>
    %7 = vector.shape_cast %6 : vector<1x16x16xf32> to vector<16x16xf32>
    %cst_9 = arith.constant 0.000000e+00 : f32
    %8 = vector.broadcast %cst_9 : f32 to vector<16x16xf32>
    %9 = vector.shape_cast %3 : vector<1x16x16xf32> to vector<16x16xf32>
    %cst_10 = arith.constant dense<0.000000e+00> : vector<16x16xf32>
    %10 = tpu.matmul %9, %7, %cst_10 {dimension_numbers = #tpu.dot_dimension_numbers<[1], [0], [0], [1], [0, 0, 1, 1], [], []>} : vector<16x16xf32>, vector<16x16xf32>, vector<16x16xf32> -> vector<16x16xf32>
    %11 = vector.shape_cast %4 : vector<1x16x16xf32> to vector<16x16xf32>
    %cst_11 = arith.constant dense<0.000000e+00> : vector<16x16xf32>
    %12 = tpu.matmul %10, %11, %cst_11 {dimension_numbers = #tpu.dot_dimension_numbers<[1], [0], [0], [1], [0, 0, 1, 1], [], []>} : vector<16x16xf32>, vector<16x16xf32>, vector<16x16xf32> -> vector<16x16xf32>
    %13 = arith.addf %8, %12 : vector<16x16xf32>
    %c0_12 = arith.constant 0 : index
    %c0_13 = arith.constant 0 : index
    %c0_14 = arith.constant 0 : index
    %c0_15 = arith.constant 0 : index
    %14 = vector.load %arg5[%c0_12, %c0_13, %c0_14, %c0_15] : memref<2x4x16x16xf32, #tpu.memory_space<vmem>>, vector<1x4x16x16xf32>
    %15 = vector.shape_cast %14 : vector<1x4x16x16xf32> to vector<4x16x16xf32>
    %16 = vector.shape_cast %13 : vector<16x16xf32> to vector<1x16x16xf32>
    %17 = vector.broadcast %16 : vector<1x16x16xf32> to vector<4x16x16xf32>
    %18 = arith.subf %15, %17 : vector<4x16x16xf32>
    %19 = arith.mulf %18, %18 : vector<4x16x16xf32>
    %cst_16 = arith.constant dense<0.000000e+00> : vector<16x16xf32>
    %20 = vector.multi_reduction <add>, %19, %cst_16 [0] : vector<4x16x16xf32> to vector<16x16xf32>
    %21 = arith.addf %5, %20 : vector<16x16xf32>
    %c1 = arith.constant 1 : index
    %c0_17 = arith.constant 0 : index
    %c0_18 = arith.constant 0 : index
    %22 = vector.load %arg4[%c1, %c0_17, %c0_18] : memref<2x16x16xf32, #tpu.memory_space<vmem>>, vector<1x16x16xf32>
    %23 = vector.shape_cast %22 : vector<1x16x16xf32> to vector<16x16xf32>
    %cst_19 = arith.constant 0.000000e+00 : f32
    %24 = vector.broadcast %cst_19 : f32 to vector<16x16xf32>
    %25 = vector.shape_cast %3 : vector<1x16x16xf32> to vector<16x16xf32>
    %cst_20 = arith.constant dense<0.000000e+00> : vector<16x16xf32>
    %26 = tpu.matmul %25, %23, %cst_20 {dimension_numbers = #tpu.dot_dimension_numbers<[1], [0], [0], [1], [0, 0, 1, 1], [], []>} : vector<16x16xf32>, vector<16x16xf32>, vector<16x16xf32> -> vector<16x16xf32>
    %27 = vector.shape_cast %4 : vector<1x16x16xf32> to vector<16x16xf32>
    %cst_21 = arith.constant dense<0.000000e+00> : vector<16x16xf32>
    %28 = tpu.matmul %26, %27, %cst_21 {dimension_numbers = #tpu.dot_dimension_numbers<[1], [0], [0], [1], [0, 0, 1, 1], [], []>} : vector<16x16xf32>, vector<16x16xf32>, vector<16x16xf32> -> vector<16x16xf32>
    %29 = arith.addf %24, %28 : vector<16x16xf32>
    %c1_22 = arith.constant 1 : index
    %c0_23 = arith.constant 0 : index
    %c0_24 = arith.constant 0 : index
    %c0_25 = arith.constant 0 : index
    %30 = vector.load %arg5[%c1_22, %c0_23, %c0_24, %c0_25] : memref<2x4x16x16xf32, #tpu.memory_space<vmem>>, vector<1x4x16x16xf32>
    %31 = vector.shape_cast %30 : vector<1x4x16x16xf32> to vector<4x16x16xf32>
    %32 = vector.shape_cast %29 : vector<16x16xf32> to vector<1x16x16xf32>
    %33 = vector.broadcast %32 : vector<1x16x16xf32> to vector<4x16x16xf32>
    %34 = arith.subf %31, %33 : vector<4x16x16xf32>
    %35 = arith.mulf %34, %34 : vector<4x16x16xf32>
    %cst_26 = arith.constant dense<0.000000e+00> : vector<16x16xf32>
    %36 = vector.multi_reduction <add>, %35, %cst_26 [0] : vector<4x16x16xf32> to vector<16x16xf32>
    %37 = arith.addf %21, %36 : vector<16x16xf32>
    %c0_27 = arith.constant 0 : index
    %c0_28 = arith.constant 0 : index
    %c0_29 = arith.constant 0 : index
    %38 = vector.load %arg6[%c0_27, %c0_28, %c0_29] : memref<1x16x16xf32, #tpu.memory_space<vmem>>, vector<1x16x16xf32>
    %39 = vector.shape_cast %37 : vector<16x16xf32> to vector<1x16x16xf32>
    %40 = arith.addf %38, %39 : vector<1x16x16xf32>
    %c0_30 = arith.constant 0 : index
    %c0_31 = arith.constant 0 : index
    %c0_32 = arith.constant 0 : index
    %41 = vector.load %arg6[%c0_30, %c0_31, %c0_32] : memref<1x16x16xf32, #tpu.memory_space<vmem>>, vector<1x16x16xf32>
    tpu.vector_store %arg6[%c0_30, %c0_31, %c0_32], %40 {strides = array<i32>} : memref<1x16x16xf32, #tpu.memory_space<vmem>>, vector<1x16x16xf32>,
    return
  }
  func.func @transform_0(%arg0: i32, %arg1: i32) -> (i32, i32, i32) {
    %c0_i32 = arith.constant 0 : i32
    %c0_i32_0 = arith.constant 0 : i32
    %c0_i32_1 = arith.constant 0 : i32
    %c0_i32_2 = arith.constant 0 : i32
    return %c0_i32, %c0_i32_0, %c0_i32_1 : i32, i32, i32
  }
  func.func @transform_1(%arg0: i32, %arg1: i32) -> (i32, i32, i32) {
    %c0_i32 = arith.constant 0 : i32
    %c0_i32_0 = arith.constant 0 : i32
    %c0_i32_1 = arith.constant 0 : i32
    %c0_i32_2 = arith.constant 0 : i32
    return %c0_i32, %c0_i32_0, %c0_i32_1 : i32, i32, i32
  }
  func.func @transform_2(%arg0: i32, %arg1: i32) -> (i32, i32, i32) {
    %c1_i32 = arith.constant 1 : i32
    %0 = arith.muli %arg0, %c1_i32 : i32
    %1 = arith.addi %0, %arg1 : i32
    %c0_i32 = arith.constant 0 : i32
    %c0_i32_0 = arith.constant 0 : i32
    %c0_i32_1 = arith.constant 0 : i32
    return %1, %c0_i32, %c0_i32_0 : i32, i32, i32
  }
  func.func @transform_3(%arg0: i32, %arg1: i32) -> (i32, i32, i32, i32) {
    %c1_i32 = arith.constant 1 : i32
    %0 = arith.muli %arg0, %c1_i32 : i32
    %1 = arith.addi %0, %arg1 : i32
    %c0_i32 = arith.constant 0 : i32
    %c0_i32_0 = arith.constant 0 : i32
    %c0_i32_1 = arith.constant 0 : i32
    %c0_i32_2 = arith.constant 0 : i32
    return %1, %c0_i32, %c0_i32_0, %c0_i32_1 : i32, i32, i32, i32
  }
  func.func @transform_4(%arg0: i32, %arg1: i32) -> (i32, i32, i32) {
    %c0_i32 = arith.constant 0 : i32
    %c0_i32_0 = arith.constant 0 : i32
    %c0_i32_1 = arith.constant 0 : i32
    return %arg0, %c0_i32, %c0_i32_0 : i32, i32, i32
  }
}

</mosaic_0001>

<bundles_post_ra>
// kernel: tpu_custom_call.1
= control target key start
LH: loop header
LB: loop body
LE: loop exit
PB: predicated region body
PF: predicated region fallthrough
CT: control target
= control target key end

     0   :  { %9 = vsyncpa [#allocation3], 0  ;;  %s872_s0 = inlined_call_operand.hbm [shape: f32[1,16,16], index: 0, kind: input, shape index: {}]   ;;  %s873_s1 = inlined_call_operand.hbm [shape: f32[1,16,16], index: 1, kind: input, shape index: {}]   ;;  %s874_s2 = inlined_call_operand.hbm [shape: f32[2,16,16], index: 2, kind: input, shape index: {}]   ;;  %s875_s3 = inlined_call_operand.hbm [shape: f32[2,4,16,16], index: 3, kind: input, shape index: {}]   ;;  %s876_s4 = inlined_call_operand.hbm [shape: f32[1,16,16], index: 4, kind: output, shape index: {}]  }
   0x1   :  { %10 = vsyncpa [#allocation6], 0 }
   0x2   :  { %11 = vsyncpa [#allocation9], 0 }
   0x3   :  { %12 = vsyncpa [#allocation4], 0  ;;  %s722_s15 = smov [#allocation5]   ;;  %s723_s17 = smov [#allocation2]  }
   0x4   :  { %s30_s16 = sshll.u32 %s722_s15, 4  ;;  %s18_s18 = sshll.u32 %s723_s17, 4  ;;  %s31_s16 = int_to_ptr.vmem [resolvable:$true] %s30_s16  ;;  %s755_s18 = int_to_ptr.vmem [resolvable:$true] %s18_s18 }
   0x5   :  { %s604_s21 = scalar_lea.hbm %s873_s1, 256 }
   0x6   :  { %p605_p0 = scmp.ne.s32.totalorder %s873_s1, %s604_s21  ;;  %p608_p1 = scmp.lt.u32.totalorder %s604_s21, %s873_s1 }
   0x8   :  { %p610_p2 = pnand %p608_p1, %p605_p0 }
   0xa   :  { %613 = shalt.err (!%p610_p2)
}
   0xb   :  { %s614_s26 = scalar_lea.vmem %s31_s16, 256  ;;  %p619_p4 = scmp.lt.s32.totalorder %s31_s16, %s31_s16 }
   0xc   :  { %p615_p3 = scmp.ne.s32.totalorder %s31_s16, %s614_s26  ;;  %p620_p5 = scmp.lt.s32.totalorder %s614_s26, %s614_s26 }
   0xe   :  { %p621_p6 = por %p620_p5, %p619_p4 }
  0x10   :  { %p622_p7 = pnand %p621_p6, %p615_p3 }
  0x12   :  { %625 = shalt.err (!%p622_p7)
}
  0x13   :  { %s724_s27 = smov 128   ;;  %s725_s28 = smov 8  }
  0x14   :  { %36 = dma.hbm_to_vmem [thread:$0]  %s873_s1, 256, %s31_s16, [#allocation6], %s724_s27, %s724_s27, %s725_s28  }
  0x15   :  { %s626_s7 = scalar_lea.hbm %s872_s0, 256 }
  0x16   :  { %p627_p8 = scmp.ne.s32.totalorder %s872_s0, %s626_s7  ;;  %p630_p9 = scmp.lt.u32.totalorder %s626_s7, %s872_s0 }
  0x18   :  { %p632_p10 = pnand %p630_p9, %p627_p8 }
  0x1a   :  { %635 = shalt.err (!%p632_p10)
}
  0x1b   :  { %s636_s12 = scalar_lea.vmem %s755_s18, 256  ;;  %p641_p12 = scmp.lt.s32.totalorder %s755_s18, %s755_s18 }
  0x1c   :  { %p637_p11 = scmp.ne.s32.totalorder %s755_s18, %s636_s12  ;;  %p642_p13 = scmp.lt.s32.totalorder %s636_s12, %s636_s12 }
  0x1e   :  { %p643_p0 = por %p642_p13, %p641_p12 }
  0x20   :  { %p644_p1 = pnand %p643_p0, %p637_p11 }
  0x22   :  { %647 = shalt.err (!%p644_p1)
}
  0x23   :  { %24 = dma.hbm_to_vmem [thread:$0]  %s872_s0, 256, %s755_s18, [#allocation3], %s724_s27, %s724_s27, %s725_s28  }
  0x24   :  { %s726_s14 = smov [#allocation7]   ;;  %s727_s16 = smov [#allocation8]  }
  0x25   :  { %s47_s15 = sshll.u32 %s726_s14, 4  ;;  %s64_s17 = sshll.u32 %s727_s16, 4  ;;  %s48_s15 = int_to_ptr.vmem [resolvable:$true] %s47_s15  ;;  %s792_s17 = int_to_ptr.vmem [resolvable:$true] %s64_s17 }
  0x26   :  { %s648_s21 = scalar_lea.hbm %s874_s2, 512 }
  0x27   :  { %p649_p2 = scmp.ne.s32.totalorder %s874_s2, %s648_s21  ;;  %p652_p3 = scmp.lt.u32.totalorder %s648_s21, %s874_s2 }
  0x29   :  { %p654_p4 = pnand %p652_p3, %p649_p2 }
  0x2b   :  { %657 = shalt.err (!%p654_p4)
}
  0x2c   :  { %s658_s0 = scalar_lea.vmem %s48_s15, 512  ;;  %p663_p6 = scmp.lt.s32.totalorder %s48_s15, %s48_s15 }
  0x2d   :  { %p659_p5 = scmp.ne.s32.totalorder %s48_s15, %s658_s0  ;;  %p664_p7 = scmp.lt.s32.totalorder %s658_s0, %s658_s0 }
  0x2f   :  { %p665_p8 = por %p664_p7, %p663_p6 }
  0x31   :  { %p666_p9 = pnand %p665_p8, %p659_p5 }
  0x33   :  { %669 = shalt.err (!%p666_p9)
}
  0x34   :  { %53 = dma.hbm_to_vmem [thread:$0]  %s874_s2, 512, %s48_s15, [#allocation6], %s724_s27, %s724_s27, %s725_s28  }
  0x35   :  { %s670_s5 = scalar_lea.hbm %s875_s3, 2048 }
  0x36   :  { %p671_p10 = scmp.ne.s32.totalorder %s875_s3, %s670_s5  ;;  %p674_p11 = scmp.lt.u32.totalorder %s670_s5, %s875_s3 }
  0x38   :  { %p676_p12 = pnand %p674_p11, %p671_p10 }
  0x3a   :  { %679 = shalt.err (!%p676_p12)
}
  0x3b   :  { %s680_s10 = scalar_lea.vmem %s792_s17, 2048  ;;  %p685_p0 = scmp.lt.s32.totalorder %s792_s17, %s792_s17 }
  0x3c   :  { %p681_p13 = scmp.ne.s32.totalorder %s792_s17, %s680_s10  ;;  %p686_p1 = scmp.lt.s32.totalorder %s680_s10, %s680_s10 }
  0x3e   :  { %p687_p2 = por %p686_p1, %p685_p0 }
  0x40   :  { %p688_p3 = pnand %p687_p2, %p681_p13 }
  0x42   :  { %691 = shalt.err (!%p688_p3)
}
  0x43   :  { %70 = dma.hbm_to_vmem [thread:$0]  %s875_s3, 2048, %s792_s17, [#allocation9], %s724_s27, %s724_s27, %s725_s28  }
  0x44   :  { %714 = dma.done.wait [#allocation3], 256  }
  0x45   :  { %715 = vsyncadd [#allocation3], 4294967040 }
  0x46   :  { %716 = dma.done.wait [#allocation6], 768  }
  0x47   :  { %717 = vsyncadd [#allocation6], 4294966528 }
  0x48   :  { %718 = dma.done.wait [#allocation9], 2048  }
  0x49   :  { %719 = vsyncadd [#allocation9], 4294965248  ;;  %vm91_vm0 = vcmask 130048   ;;  %v98_v0 = vld [vmem:[#allocation7] sm:$0xff]  ;;  %v99_v1 = vld [vmem:[#allocation7 + $0x8] sm:$0xff]  ;;  %v728_v15 = vmov 0.0  }
  0x4a   :  { %v94_v2 = vld [vmem:[#allocation2] sm:$0xff]  ;;  %v580_v3 = vpack.c.bf16 %v99_v1, %v98_v0  ;;  %v304_v4 = vld [vmem:[#allocation7 + $0x10] sm:$0xff]  ;;  %v305_v5 = vld [vmem:[#allocation7 + $0x18] sm:$0xff]  ;;  %92 = vst.msk [vmem:[#allocation10] sm:$0xff] %vm91_vm0, %v728_v15  ;;  %s729_s3 = smov [#allocation10]  }
  0x4b   :  { %556 = vmatprep.mubr.msk.f32.mxu0 %vm91_vm0, %v94_v2  ;;  %v588_v6 = vpack.c.bf16 %v305_v5, %v304_v4  ;;  %v96_v7 = vld [vmem:[#allocation5] sm:$0xff]  ;;  %v97_v8 = vld [vmem:[#allocation5 + $0x8] sm:$0xff]  ;;  %v95_v10 = vld [vmem:[#allocation2 + $0x8] sm:$0xff]  ;;  %93 = vst.msk [vmem:[#allocation10 + $0x8] sm:$0xff] %vm91_vm0, %v728_v15  ;;  %s514_s12 = sshll.u32 %s729_s3, 4  ;;  %s515_s12 = int_to_ptr.vmem [resolvable:$true] %s514_s12 }
  0x4c   :  { %581 = vmatprep.subr.bf16.mxu0 %v580_v3  ;;  %v584_v9 = vpack.c.bf16 %v97_v8, %v96_v7  ;;  %v264_v16 = vld [vmem:[#allocation8 + $0x8] sm:$0xff]  ;;  %v266_v17 = vld [vmem:[#allocation8 + $0x18] sm:$0xff]  ;;  %v263_v19 = vld [vmem:[#allocation8] sm:$0xff]  ;;  %s692_s1 = scalar_lea.vmem %s515_s12, 256  ;;  %p697_p5 = scmp.lt.s32.totalorder %s515_s12, %s515_s12 }
  0x4d   :  { %583 = vmatpush3.bf16.msra.mxu0 %v580_v3  ;;  %v268_v18 = vld [vmem:[#allocation8 + $0x28] sm:$0xff]  ;;  %v265_v20 = vld [vmem:[#allocation8 + $0x10] sm:$0xff]  ;;  %v270_v22 = vld [vmem:[#allocation8 + $0x38] sm:$0xff]  ;;  %p693_p4 = scmp.ne.s32.totalorder %s515_s12, %s692_s1  ;;  %p698_p6 = scmp.lt.s32.totalorder %s692_s1, %s692_s1 }
  0x4e   :  { %589 = vmatprep.subr.bf16.mxu0 %v588_v6  ;;  %585 = vmatprep.subr.bf16.mxu1 %v584_v9  ;;  %v267_v32 = vld [vmem:[#allocation8 + $0x20] sm:$0xff]  ;;  %v269_v33 = vld [vmem:[#allocation8 + $0x30] sm:$0xff]  ;;  %v464_v36 = vld [vmem:[#allocation8 + $0x48] sm:$0xff] }
  0x4f   :  { %587 = vmatpush3.bf16.msra.mxu1 %v584_v9  ;;  %v466_v37 = vld [vmem:[#allocation8 + $0x58] sm:$0xff]  ;;  %v468_v41 = vld [vmem:[#allocation8 + $0x68] sm:$0xff]  ;;  %v463_v44 = vld [vmem:[#allocation8 + $0x40] sm:$0xff]  ;;  %p699_p7 = por %p698_p6, %p697_p5 }
  0x50   :  { %557 = vmatmul.mubr.msk.f32.vlgmr.msra.gmra.mrb[0].mxu0 %vm91_vm0, %v95_v10  ;;  %593 = vmatprep.subr.bf16.mxu1 %v584_v9  ;;  %v470_v42 = vld [vmem:[#allocation8 + $0x78] sm:$0xff]  ;;  %v465_v48 = vld [vmem:[#allocation8 + $0x50] sm:$0xff]  ;;  %v467_v53 = vld [vmem:[#allocation8 + $0x60] sm:$0xff] }
  0x51   :  { %591 = vmatpush3.bf16.msra.mxu0 %v588_v6  ;;  %570 = vmatprep.mubr.msk.f32.mxu0 %vm91_vm0, %v94_v2  ;;  %v469_v57 = vld [vmem:[#allocation8 + $0x70] sm:$0xff]  ;;  %p700_p8 = pnand %p699_p7, %p693_p4 }
  0x54   :  { %571 = vmatmul.mubr.msk.f32.vlgmr.msra.gmra.mrb[2].mxu0 %vm91_vm0, %v95_v10 }
 0x123   :  { %v558_v11 = vpop.f32.mrb[0].mxu0 }
 0x124   :  { %v173_v12 = vpop.f32.mrb[1].mxu0 }
 0x125   :  { %563 = vmatprep.mubr.msk.f32.mxu1 %vm91_vm0, %v173_v12 }
 0x126   :  { %564 = vmatmul.mubr.msk.f32.vlgmr.msra.gmra.mrb[0].mxu1 %vm91_vm0, %v558_v11 }
 0x127   :  { %v572_v13 = vpop.f32.mrb[2].mxu0  ;;  %595 = vmatpush3.bf16.msra.mxu1 %v584_v9 }
 0x128   :  { %v372_v14 = vpop.f32.mrb[3].mxu0 }
 0x129   :  { %577 = vmatprep.mubr.msk.f32.mxu1 %vm91_vm0, %v372_v14 }
 0x12a   :  { %578 = vmatmul.mubr.msk.f32.vlgmr.msra.gmra.mrb[2].mxu1 %vm91_vm0, %v572_v13 }
 0x1f9   :  { %v565_v21 = vpop.f32.mrb[0].mxu1 }
 0x1fa   :  { %v272_v23 = vsub.f32 %v264_v16, %v565_v21  ;;  %v274_v24 = vsub.f32 %v266_v17, %v565_v21  ;;  %v254_v25 = vpop.f32.mrb[1].mxu1  ;;  %v276_v26 = vsub.f32 %v268_v18, %v565_v21  ;;  %v278_v29 = vsub.f32 %v270_v22, %v565_v21 }
 0x1fb   :  { %v271_v27 = vsub.f32 %v263_v19, %v254_v25  ;;  %v273_v28 = vsub.f32 %v265_v20, %v254_v25  ;;  %v275_v46 = vsub.f32 %v267_v32, %v254_v25  ;;  %v277_v47 = vsub.f32 %v269_v33, %v254_v25 }
 0x1fc   :  { %v280_v30 = vmul.f32 %v272_v23, %v272_v23  ;;  %v282_v31 = vmul.f32 %v274_v24, %v274_v24  ;;  %v284_v45 = vmul.f32 %v276_v26, %v276_v26  ;;  %v286_v49 = vmul.f32 %v278_v29, %v278_v29 }
 0x1fd   :  { %v279_v34 = vmul.f32 %v271_v27, %v271_v27  ;;  %v579_v35 = vpop.f32.mrb[2].mxu1  ;;  %v281_v40 = vmul.f32 %v273_v28, %v273_v28  ;;  %v283_v0 = vmul.f32 %v275_v46, %v275_v46  ;;  %v285_v15 = vmul.f32 %v277_v47, %v277_v47  ;;  %v504_v27 = vld [vmem:[#allocation10 + $0x8] sm:$0xff] }
 0x1fe   :  { %v294_v38 = vsel %vm91_vm0, %v280_v30, 0.0  ;;  %v295_v39 = vsel %vm91_vm0, %v282_v31, 0.0  ;;  %v453_v43 = vpop.f32.mrb[3].mxu1  ;;  %v472_v51 = vsub.f32 %v464_v36, %v579_v35  ;;  %v474_v52 = vsub.f32 %v466_v37, %v579_v35 }
 0x1ff   :  { %v296_v50 = vadd.f32 %v295_v39, %v294_v38  ;;  %v287_v54 = vsel %vm91_vm0, %v279_v34, 0.0  ;;  %v476_v55 = vsub.f32 %v468_v41, %v579_v35  ;;  %v478_v56 = vsub.f32 %v470_v42, %v579_v35  ;;  %v503_v35 = vld [vmem:[#allocation10] sm:$0xff] }
 0x200   :  { %v471_v58 = vsub.f32 %v463_v44, %v453_v43  ;;  %v288_v59 = vsel %vm91_vm0, %v281_v40, 0.0  ;;  %v480_v60 = vmul.f32 %v472_v51, %v472_v51  ;;  %v482_v61 = vmul.f32 %v474_v52, %v474_v52 }
 0x201   :  { %v473_v62 = vsub.f32 %v465_v48, %v453_v43  ;;  %v297_v63 = vsel %vm91_vm0, %v284_v45, 0.0  ;;  %v484_v1 = vmul.f32 %v476_v55, %v476_v55  ;;  %v475_v2 = vsub.f32 %v467_v53, %v453_v43 }
 0x202   :  { %v486_v3 = vmul.f32 %v478_v56, %v478_v56  ;;  %v494_v4 = vsel %vm91_vm0, %v480_v60, 0.0  ;;  %v495_v5 = vsel %vm91_vm0, %v482_v61, 0.0  ;;  %v477_v6 = vsub.f32 %v469_v57, %v453_v43 }
 0x203   :  { %v298_v7 = vadd.f32 %v297_v63, %v296_v50  ;;  %v289_v8 = vadd.f32 %v288_v59, %v287_v54  ;;  %v496_v9 = vadd.f32 %v495_v5, %v494_v4  ;;  %v479_v10 = vmul.f32 %v471_v58, %v471_v58 }
 0x204   :  { %v497_v11 = vsel %vm91_vm0, %v484_v1, 0.0  ;;  %v481_v12 = vmul.f32 %v473_v62, %v473_v62  ;;  %v483_v13 = vmul.f32 %v475_v2, %v475_v2  ;;  %v299_v14 = vsel %vm91_vm0, %v286_v49, 0.0 }
 0x205   :  { %v498_v16 = vadd.f32 %v497_v11, %v496_v9  ;;  %v487_v17 = vsel %vm91_vm0, %v479_v10, 0.0  ;;  %v290_v18 = vsel %vm91_vm0, %v283_v0, 0.0  ;;  %v499_v19 = vsel %vm91_vm0, %v486_v3, 0.0 }
 0x206   :  { %v485_v20 = vmul.f32 %v477_v6, %v477_v6  ;;  %v488_v21 = vsel %vm91_vm0, %v481_v12, 0.0  ;;  %v300_v22 = vadd.f32 %v299_v14, %v298_v7  ;;  %v291_v23 = vadd.f32 %v290_v18, %v289_v8 }
 0x207   :  { %v500_v24 = vadd.f32 %v499_v19, %v498_v16  ;;  %v489_v25 = vadd.f32 %v488_v21, %v487_v17  ;;  %v490_v26 = vsel %vm91_vm0, %v483_v13, 0.0  ;;  %v292_v30 = vsel %vm91_vm0, %v285_v15, 0.0 }
 0x208   :  { %v492_v31 = vsel %vm91_vm0, %v485_v20, 0.0  ;;  %v293_v32 = vadd.f32 %v292_v30, %v291_v23 }
 0x209   :  { %v502_v28 = vadd.f32 %v500_v24, %v300_v22  ;;  %v491_v29 = vadd.f32 %v490_v26, %v489_v25 }
 0x20b   :  { %v493_v33 = vadd.f32 %v492_v31, %v491_v29  ;;  %v506_v34 = vadd.f32 %v504_v27, %v502_v28 }
 0x20d   :  { %v501_v36 = vadd.f32 %v493_v33, %v293_v32  ;;  %508 = vst.msk [vmem:[#allocation10 + $0x8] sm:$0xff] %vm91_vm0, %v506_v34 }
 0x20f   :  { %v505_v37 = vadd.f32 %v503_v35, %v501_v36 }
 0x211   :  { %507 = vst.msk [vmem:[#allocation10] sm:$0xff] %vm91_vm0, %v505_v37 }
 0x212   :  { %703 = shalt.err (!%p700_p8)
}
 0x213   :  { %s704_s15 = scalar_lea.hbm %s876_s4, 256 }
 0x214   :  { %p705_p9 = scmp.ne.s32.totalorder %s876_s4, %s704_s15  ;;  %p708_p10 = scmp.lt.u32.totalorder %s704_s15, %s876_s4 }
 0x216   :  { %p710_p11 = pnand %p708_p10, %p705_p9 }
 0x218   :  { %713 = shalt.err (!%p710_p11)
}
 0x219   :  { %520 = dma.vmem_to_hbm [thread:$0]  %s515_s12, 256, %s876_s4, [#allocation4], %s724_s27, %s724_s27, %s725_s28  }
 0x21a   :  { %720 = dma.done.wait [#allocation4], 256  }
 0x21b   :  { %721 = vsyncadd [#allocation4], 4294967040 }
 0x21c   :  { %524 = vsyncpa [#allocation3], 1 }
 0x21d   :  { %525 = vsyncpa [#allocation6], 1 }
 0x21e   :  { %526 = vsyncpa [#allocation9], 1 }
 0x21f   :  { %527 = vsyncpa [#allocation4], 1 }

</bundles_post_ra>
